<compile_context>
chip_gen: v7x
topology: tpu7x:2x2x1
jax: 0.10.0
libtpu: 0.0.40
codegen_flags: <defaults>
</compile_context>

<pallas_src>
import jax
import jax.numpy as jnp
from jax.experimental import pallas as pl
from jax.experimental.pallas import tpu as pltpu


_K0 = 0.044715
_K1 = 0.7978845608028654


def _conv1x1_gelu_kernel(x_ref, w_ref, b_ref, o_ref):
    # x_ref: (Nb, Cin, TL)  lane dim = spatial tile (multiple of 128)
    # w_ref: (Cout, Cin), b_ref: (Cout, 1), o_ref: (Nb, Cout, TL)
    w = w_ref[...]
    b = b_ref[...]
    nb = x_ref.shape[0]
    for i in range(nb):                     # static unroll: one MXU dot per image
        x = x_ref[i]                                                  # (Cin, TL)
        v1 = jnp.dot(w, x, preferred_element_type=jnp.float32) + b    # (Cout, TL) f32
        inner = v1 * (1.0 + _K0 * (v1 * v1))       # = v1 + 0.044715*v1^3 (fewer muls)
        t = jnp.tanh(_K1 * inner)                  # EUP slot
        o_ref[i] = (0.5 * v1 * (1.0 + t)).astype(o_ref.dtype)


def _pick_tiling(N, Cin, Lp, elem_bytes):
    """Choose (nb, grid_n, tl, grid_l) for grid=(grid_n, grid_l), block=(nb, Cin, tl)."""
    tl = min(Lp, 8192)                       # lane tile cap (fits v5e/v6e/v7x VMEM)
    grid_l = pl.cdiv(Lp, tl)
    # Batch images per block to amortize per-step overhead; cap block input ~4 MiB
    # (double-buffered -> ~8 MiB), well inside every chip's scoped VMEM limit.
    per_image_bytes = Cin * tl * elem_bytes
    max_nb = max(1, (4 * 1024 * 1024) // per_image_bytes)
    nb = 1
    for d in range(1, N + 1):
        if N % d == 0 and d <= max_nb:
            nb = d
    grid_n = N // nb
    # Keep at least 2 grid points so both v7x TensorCores contribute HBM bandwidth.
    if grid_n * grid_l < 2:
        if tl >= 256 and tl % 256 == 0:
            tl //= 2
            grid_l = pl.cdiv(Lp, tl)
        elif nb > 1:
            nb = max(d for d in range(1, nb) if N % d == 0)
            grid_n = N // nb
    return nb, grid_n, tl, grid_l


def conv1x1_pad1_gelu(x_nchw, weight, bias, *, use_bf16_inputs=False):
    """x_nchw: (N, 32, H, W) f32; weight: (8, 32); bias: (8,).
    Returns (N, 8, H+2, W+2) f32, matching Conv2d(32, 8, 1, padding=1) + tanh-GELU chain."""
    N, Cin, H, W = x_nchw.shape
    Cout = weight.shape[0]
    Ho, Wo = H + 2, W + 2
    L = H * W

    in_dtype = jnp.bfloat16 if use_bf16_inputs else jnp.float32
    elem_bytes = 2 if use_bf16_inputs else 4

    # NCHW is already channels-leading for the W @ x formulation: no transpose needed.
    x_flat = x_nchw.reshape(N, Cin, L).astype(in_dtype)              # (N, Cin, L)
    w = weight.astype(in_dtype)                                      # (Cout, Cin)
    b2 = bias.reshape(Cout, 1).astype(jnp.float32)                   # (Cout, 1)

    # Always keep the lane dim a multiple of 128 (lane-dense stores, bounded tiles).
    Lp = ((L + 127) // 128) * 128
    if Lp != L:
        x_flat = jnp.pad(x_flat, ((0, 0), (0, 0), (0, Lp - L)))

    nb, grid_n, tl, grid_l = _pick_tiling(N, Cin, Lp, elem_bytes)

    cost = pl.CostEstimate(
        flops=2 * N * L * Cin * Cout,
        transcendentals=N * Cout * L,
        bytes_accessed=elem_bytes * (N * Cin * L + Cin * Cout)
        + 4 * (N * Cout * L + Cout),
    )

    interior = pl.pallas_call(
        _conv1x1_gelu_kernel,
        out_shape=jax.ShapeDtypeStruct((N, Cout, Lp), jnp.float32),
        grid_spec=pltpu.PrefetchScalarGridSpec(
            num_scalar_prefetch=0,
            grid=(grid_n, grid_l),
            in_specs=[
                pl.BlockSpec((nb, Cin, tl), lambda n, j: (n, 0, j)),
                pl.BlockSpec((Cout, Cin), lambda n, j: (0, 0)),
                pl.BlockSpec((Cout, 1), lambda n, j: (0, 0)),
            ],
            out_specs=pl.BlockSpec((nb, Cout, tl), lambda n, j: (n, 0, j)),
        ),
        compiler_params=pltpu.CompilerParams(
            dimension_semantics=("parallel", "parallel"),
        ),
        cost_estimate=cost,
    )(x_flat, w, b2)

    if Lp != L:
        interior = interior[:, :, :L]
    interior = interior.reshape(N, Cout, H, W)

    # Border pixels see only the bias (padded input is zero): push bias through the chain.
    b = bias.astype(jnp.float32)
    border = 0.5 * b * (1.0 + jnp.tanh(_K1 * (b * (1.0 + _K0 * (b * b)))))  # (Cout,)
    out = jnp.broadcast_to(border[None, :, None, None], (N, Cout, Ho, Wo))
    out = jax.lax.dynamic_update_slice(out, interior, (0, 0, 1, 1))
    return out


def _reference(x_nchw, weight, bias):
    # Pure-JAX reference of the PyTorch forward.
    x_pad = jnp.pad(x_nchw, ((0, 0), (0, 0), (1, 1), (1, 1)))
    v1 = jnp.einsum("nchw,oc->nohw", x_pad, weight) + bias[None, :, None, None]
    v2 = v1 * 0.5
    v3 = v1 + v1 * v1 * v1 * 0.044715
    v4 = v3 * 0.7978845608028654
    v5 = jnp.tanh(v4)
    v6 = v5 + 1.0
    return v2 * v6


if __name__ == "__main__":
    key = jax.random.PRNGKey(0)
    k_x, k_w, k_b = jax.random.split(key, 3)

    N, Cin, H, W = 2, 32, 16, 16
    Cout = 8

    x = jax.random.normal(k_x, (N, Cin, H, W), dtype=jnp.float32)
    # Deterministic parameter init (PyTorch-style uniform bound 1/sqrt(fan_in)).
    bound = 1.0 / (Cin ** 0.5)
    weight = jax.random.uniform(k_w, (Cout, Cin), minval=-bound, maxval=bound,
                                dtype=jnp.float32)
    bias = jax.random.uniform(k_b, (Cout,), minval=-bound, maxval=bound,
                              dtype=jnp.float32)

    fn = jax.jit(conv1x1_pad1_gelu)
    out = fn(x, weight, bias)
    out = jax.block_until_ready(out)

    ref = _reference(x, weight, bias)
    assert out.shape == (N, Cout, H + 2, W + 2), out.shape
    assert jnp.allclose(out, ref, atol=1e-5, rtol=1e-5), float(jnp.max(jnp.abs(out - ref)))

    print("KERNEL_OK")
</pallas_src>

<mosaic_0001>
module attributes {stable_mosaic.version = 11 : i64} {
  func.func @_conv1x1_gelu_kernel(%arg0: i32, %arg1: i32, %arg2: memref<2x32x128xf32, #tpu.memory_space<vmem>>, %arg3: memref<8x32xf32, #tpu.memory_space<vmem>>, %arg4: memref<8x1xf32, #tpu.memory_space<vmem>>, %arg5: memref<2x8x128xf32, #tpu.memory_space<vmem>>) attributes {dimension_semantics = [#tpu.dimension_semantics<parallel>, #tpu.dimension_semantics<parallel>], iteration_bounds = array<i64: 1, 2>, scalar_prefetch = 0 : i64, scratch_operands = 0 : i64, tpu.core_type = #tpu.core_type<tc>, window_params = [{transform_indices = @transform_0, window_bounds = array<i64: 2, 32, 128>}, {pipeline_mode = #tpu.pipeline_mode<synchronous>, transform_indices = @transform_1, window_bounds = array<i64: 8, 32>}, {pipeline_mode = #tpu.pipeline_mode<synchronous>, transform_indices = @transform_2, window_bounds = array<i64: 8, 1>}, {transform_indices = @transform_3, window_bounds = array<i64: 2, 8, 128>}]} {
    %c0 = arith.constant 0 : index
    %c0_0 = arith.constant 0 : index
    %0 = vector.load %arg3[%c0, %c0_0] : memref<8x32xf32, #tpu.memory_space<vmem>>, vector<8x32xf32>
    %c0_1 = arith.constant 0 : index
    %c0_2 = arith.constant 0 : index
    %1 = vector.load %arg4[%c0_1, %c0_2] : memref<8x1xf32, #tpu.memory_space<vmem>>, vector<8x1xf32>
    %c0_3 = arith.constant 0 : index
    %c0_4 = arith.constant 0 : index
    %c0_5 = arith.constant 0 : index
    %2 = vector.load %arg2[%c0_3, %c0_4, %c0_5] : memref<2x32x128xf32, #tpu.memory_space<vmem>>, vector<1x32x128xf32>
    %3 = vector.shape_cast %2 : vector<1x32x128xf32> to vector<32x128xf32>
    %cst = arith.constant dense<0.000000e+00> : vector<8x128xf32>
    %4 = tpu.matmul %0, %3, %cst {dimension_numbers = #tpu.dot_dimension_numbers<[1], [0], [0], [1], [0, 0, 1, 1], [], []>} : vector<8x32xf32>, vector<32x128xf32>, vector<8x128xf32> -> vector<8x128xf32>
    %5 = vector.broadcast %1 : vector<8x1xf32> to vector<8x128xf32>
    %6 = arith.addf %4, %5 : vector<8x128xf32>
    %7 = arith.mulf %6, %6 : vector<8x128xf32>
    %cst_6 = arith.constant 4.471500e-02 : f32
    %8 = vector.broadcast %cst_6 : f32 to vector<8x128xf32>
    %9 = arith.mulf %8, %7 : vector<8x128xf32>
    %cst_7 = arith.constant 1.000000e+00 : f32
    %10 = vector.broadcast %cst_7 : f32 to vector<8x128xf32>
    %11 = arith.addf %10, %9 : vector<8x128xf32>
    %12 = arith.mulf %6, %11 : vector<8x128xf32>
    %cst_8 = arith.constant 0.797884583 : f32
    %13 = vector.broadcast %cst_8 : f32 to vector<8x128xf32>
    %14 = arith.mulf %13, %12 : vector<8x128xf32>
    %15 = math.tanh %14 : vector<8x128xf32>
    %cst_9 = arith.constant 5.000000e-01 : f32
    %16 = vector.broadcast %cst_9 : f32 to vector<8x128xf32>
    %17 = arith.mulf %16, %6 : vector<8x128xf32>
    %cst_10 = arith.constant 1.000000e+00 : f32
    %18 = vector.broadcast %cst_10 : f32 to vector<8x128xf32>
    %19 = arith.addf %18, %15 : vector<8x128xf32>
    %20 = arith.mulf %17, %19 : vector<8x128xf32>
    %c0_11 = arith.constant 0 : index
    %c0_12 = arith.constant 0 : index
    %c0_13 = arith.constant 0 : index
    %21 = vector.load %arg5[%c0_11, %c0_12, %c0_13] : memref<2x8x128xf32, #tpu.memory_space<vmem>>, vector<1x8x128xf32>
    %22 = vector.shape_cast %21 : vector<1x8x128xf32> to vector<8x128xf32>
    %23 = vector.shape_cast %20 : vector<8x128xf32> to vector<1x8x128xf32>
    tpu.vector_store %arg5[%c0_11, %c0_12, %c0_13], %23 {strides = array<i32>} : memref<2x8x128xf32, #tpu.memory_space<vmem>>, vector<1x8x128xf32>,
    %c1 = arith.constant 1 : index
    %c0_14 = arith.constant 0 : index
    %c0_15 = arith.constant 0 : index
    %24 = vector.load %arg2[%c1, %c0_14, %c0_15] : memref<2x32x128xf32, #tpu.memory_space<vmem>>, vector<1x32x128xf32>
    %25 = vector.shape_cast %24 : vector<1x32x128xf32> to vector<32x128xf32>
    %cst_16 = arith.constant dense<0.000000e+00> : vector<8x128xf32>
    %26 = tpu.matmul %0, %25, %cst_16 {dimension_numbers = #tpu.dot_dimension_numbers<[1], [0], [0], [1], [0, 0, 1, 1], [], []>} : vector<8x32xf32>, vector<32x128xf32>, vector<8x128xf32> -> vector<8x128xf32>
    %27 = vector.broadcast %1 : vector<8x1xf32> to vector<8x128xf32>
    %28 = arith.addf %26, %27 : vector<8x128xf32>
    %29 = arith.mulf %28, %28 : vector<8x128xf32>
    %cst_17 = arith.constant 4.471500e-02 : f32
    %30 = vector.broadcast %cst_17 : f32 to vector<8x128xf32>
    %31 = arith.mulf %30, %29 : vector<8x128xf32>
    %cst_18 = arith.constant 1.000000e+00 : f32
    %32 = vector.broadcast %cst_18 : f32 to vector<8x128xf32>
    %33 = arith.addf %32, %31 : vector<8x128xf32>
    %34 = arith.mulf %28, %33 : vector<8x128xf32>
    %cst_19 = arith.constant 0.797884583 : f32
    %35 = vector.broadcast %cst_19 : f32 to vector<8x128xf32>
    %36 = arith.mulf %35, %34 : vector<8x128xf32>
    %37 = math.tanh %36 : vector<8x128xf32>
    %cst_20 = arith.constant 5.000000e-01 : f32
    %38 = vector.broadcast %cst_20 : f32 to vector<8x128xf32>
    %39 = arith.mulf %38, %28 : vector<8x128xf32>
    %cst_21 = arith.constant 1.000000e+00 : f32
    %40 = vector.broadcast %cst_21 : f32 to vector<8x128xf32>
    %41 = arith.addf %40, %37 : vector<8x128xf32>
    %42 = arith.mulf %39, %41 : vector<8x128xf32>
    %c1_22 = arith.constant 1 : index
    %c0_23 = arith.constant 0 : index
    %c0_24 = arith.constant 0 : index
    %43 = vector.load %arg5[%c1_22, %c0_23, %c0_24] : memref<2x8x128xf32, #tpu.memory_space<vmem>>, vector<1x8x128xf32>
    %44 = vector.shape_cast %43 : vector<1x8x128xf32> to vector<8x128xf32>
    %45 = vector.shape_cast %42 : vector<8x128xf32> to vector<1x8x128xf32>
    tpu.vector_store %arg5[%c1_22, %c0_23, %c0_24], %45 {strides = array<i32>} : memref<2x8x128xf32, #tpu.memory_space<vmem>>, vector<1x8x128xf32>,
    return
  }
  func.func @transform_0(%arg0: i32, %arg1: i32) -> (i32, i32, i32) {
    %c0_i32 = arith.constant 0 : i32
    %c0_i32_0 = arith.constant 0 : i32
    return %arg0, %c0_i32, %arg1 : i32, i32, i32
  }
  func.func @transform_1(%arg0: i32, %arg1: i32) -> (i32, i32) {
    %c0_i32 = arith.constant 0 : i32
    %c0_i32_0 = arith.constant 0 : i32
    %c0_i32_1 = arith.constant 0 : i32
    return %c0_i32, %c0_i32_0 : i32, i32
  }
  func.func @transform_2(%arg0: i32, %arg1: i32) -> (i32, i32) {
    %c0_i32 = arith.constant 0 : i32
    %c0_i32_0 = arith.constant 0 : i32
    %c0_i32_1 = arith.constant 0 : i32
    return %c0_i32, %c0_i32_0 : i32, i32
  }
  func.func @transform_3(%arg0: i32, %arg1: i32) -> (i32, i32, i32) {
    %c0_i32 = arith.constant 0 : i32
    %c0_i32_0 = arith.constant 0 : i32
    return %arg0, %c0_i32, %arg1 : i32, i32, i32
  }
}

</mosaic_0001>

<bundles_post_ra>
// kernel: conv1x1_pad1_gelu.1
= control target key start
LH: loop header
LB: loop body
LE: loop exit
PB: predicated region body
PF: predicated region fallthrough
CT: control target
= control target key end

     0   :  { %s723_s12 = smov 0   ;;  %s725_s13 = smov 0   ;;  %s805_s0 = inlined_call_operand.vmem [shape: f32[2,32,256], index: 0, kind: input, shape index: {}]   ;;  %s806_s1 = inlined_call_operand.vmem [shape: f32[8,32], index: 1, kind: input, shape index: {}]   ;;  %s807_s2 = inlined_call_operand.vmem [shape: f32[8,1], index: 2, kind: input, shape index: {}]   ;;  %s808_s3 = inlined_call_operand.vmem [shape: f32[2,8,256], index: 3, kind: output, shape index: {}]  }
   0x1   :  { %s727_s14 = smov 0   ;;  %s729_s15 = smov 0  }
   0x2   :  { %s731_s16 = smov 0  }
   0x3 LB: > { %s22_s17 = sadd.s32 1, %s693_s15  ;;  %s546_s18 = sadd.s32 4294967295, %s697_s16   ;;  %s697_s16 = sphi %s731_s16, %s13_s16   ;;  %s693_s15 = sphi %s729_s15, %s813_s15   ;;  %s689_s14 = sphi %s727_s14, %s812_s14   ;;  %s685_s13 = sphi %s725_s13, %s811_s13   ;;  %s681_s12 = sphi %s723_s12, %s810_s12  }
   0x4   : > { %p23_p0 = scmp.ge.s32.totalorder %s22_s17, 2  ;;  %p41_p1 = scmp.ne.s32.totalorder %s685_s13, %s681_s12 }
   0x5   : > { %p42_p2 = scmp.eq.s32.totalorder %s697_s16, 0  ;;  %p115_p4 = scmp.eq.s32.totalorder %s546_s18, 1 }
   0x6   : > { %s815_s17 = smov (%p23_p0, %s22_s17), 0  ;;  %s34_s20 = sadd.s32 1, %s685_s13 }
   0x7   : > { %p43_p3 = por %p42_p2, %p41_p1  ;;  %s30_s19 = ssub.s32 %s693_s15, %s815_s17 }
   0x8   : > { %p32_p5 = scmp.eq.s32.totalorder %s30_s19, 0  ;;  %p758_p6 = por %p115_p4, %p41_p1 }
   0x9   : > { %p549_p7 = scmp.ge.s32.totalorder %s697_s16, 2 }
   0xa   : > { %s763_s22 = scalar_select %p32_p5, %s685_s13, %s34_s20  }
   0xb   : > { %143 = sbr.rel (%p549_p7) target bundleno = 26 (0x1a), region = 24 }
  0x12   : > { %146 = sbr.rel (!%p43_p3) target bundleno = 26 (0x1a), region = 28  ;;  %s148_s23 = sand.u32 (%p43_p3), 1, %s685_s13  }
  0x13   : > { %s551_s24 = sshll.u32 (%p43_p3), %s693_s15, 3  ;;  %s550_s25 = sshll.u32 (%p43_p3), %s148_s23, 6 }
  0x14   : > { %s155_s28 = scalar_lea.vmem (%p43_p3), %s805_s0, %s551_s24  ;;  %s150_s29 = scalar_lea.vmem (%p43_p3), [#allocation2], %s550_s25 }
  0x15   : > { %v197_v0 = vld [vmem:[%s155_s28] sm:$0xff] (%p43_p3)  ;;  %v199_v1 = vld [vmem:[%s155_s28 + $0x10] sm:$0xff] (%p43_p3) }
  0x16   : > { %v201_v2 = vld [vmem:[%s155_s28 + $0x20] sm:$0xff] (%p43_p3)  ;;  %198 = vst [vmem:[%s150_s29] sm:$0xff] (%p43_p3), %v197_v0  ;;  %200 = vst [vmem:[%s150_s29 + $0x8] sm:$0xff] (%p43_p3), %v199_v1  ;;  %v203_v3 = vld [vmem:[%s155_s28 + $0x30] sm:$0xff] (%p43_p3) }
  0x17   : > { %202 = vst [vmem:[%s150_s29 + $0x10] sm:$0xff] (%p43_p3), %v201_v2  ;;  %v205_v4 = vld [vmem:[%s155_s28 + $0x40] sm:$0xff] (%p43_p3)  ;;  %v207_v5 = vld [vmem:[%s155_s28 + $0x50] sm:$0xff] (%p43_p3)  ;;  %204 = vst [vmem:[%s150_s29 + $0x18] sm:$0xff] (%p43_p3), %v203_v3 }
  0x18   : > { %206 = vst [vmem:[%s150_s29 + $0x20] sm:$0xff] (%p43_p3), %v205_v4  ;;  %208 = vst [vmem:[%s150_s29 + $0x28] sm:$0xff] (%p43_p3), %v207_v5  ;;  %v209_v6 = vld [vmem:[%s155_s28 + $0x60] sm:$0xff] (%p43_p3)  ;;  %v211_v7 = vld [vmem:[%s155_s28 + $0x70] sm:$0xff] (%p43_p3) }
  0x19   : > { %210 = vst [vmem:[%s150_s29 + $0x30] sm:$0xff] %v209_v6  ;;  %212 = vst [vmem:[%s150_s29 + $0x38] sm:$0xff] %v211_v7 }
  0x1a PF: > { %p552_p8 = scmp.ge.s32.totalorder %s697_s16, 1  ;;  %p217_p9 = scmp.lt.s32.totalorder %s697_s16, 3 }
  0x1c   : > { %p218_p10 = pnand %p552_p8, %p217_p9 }
  0x1d   : > { %s224_s30 = sand.u32 (!%p218_p10), 1, %s681_s12   ;;  %v699_v8 = vmov (!%p218_p10), 0.0|0.0   ;;  %v249_v9 = vld [vmem:[%s807_s2] sm:$0xff] (!%p218_p10)  ;;  %vm700_vm0 = vmmov (!%p218_p10), 0   ;;  %v701_v10 = vmov (!%p218_p10), 0.0   ;;  %v702_v14 = vmov (!%p218_p10), 0  }
  0x1e   : > { %221 = sbr.rel (%p218_p10) target bundleno = 291 (0x123), region = 66  ;;  %598 = vmatprep.subr.bf16.mxu0 (!%p218_p10), %v699_v8  ;;  %604 = vmatprep.subr.bf16.mxu1 (!%p218_p10), %v699_v8  ;;  %s553_s4 = sshll.u32 (!%p218_p10), %s224_s30, 6  ;;  %v248_v24 = vld [vmem:[%s806_s1] sm:$0xff] (!%p218_p10)  ;;  %vm259_vm1 = vcmask (!%p218_p10), 261120  }
  0x1f   : > { %584 = vmatprep.mubr.msk.f32.mxu0 (!%p218_p10), %vm700_vm0, %v701_v10  ;;  %595 = vmatprep.mubr.msk.f32.mxu1 (!%p218_p10), %vm700_vm0, %v701_v10  ;;  %s226_s7 = scalar_lea.vmem (!%p218_p10), [#allocation2], %s553_s4  ;;  %s554_s10 = sshll.u32 (!%p218_p10), %s224_s30, 4 }
  0x20   : > { %v250_v11 = vld [vmem:[%s226_s7] sm:$0xff] (!%p218_p10)  ;;  %v251_v12 = vld [vmem:[%s226_s7 + $0x8] sm:$0xff] (!%p218_p10)  ;;  %654 = vset.pattern.permute.xlu0 (!%p218_p10), %v702_v14  ;;  %v252_v17 = vld [vmem:[%s226_s7 + $0x10] sm:$0xff] (!%p218_p10)  ;;  %s245_s11 = scalar_lea.vmem (!%p218_p10), [#allocation3], %s554_s10 }
  0x21   : > { %v556_v13 = vld [vmem:[%s226_s7 + $0x20] sm:$0xff] (!%p218_p10)  ;;  %v599_v15 = vpack.c.bf16 (!%p218_p10), %v251_v12, %v250_v11  ;;  %v557_v16 = vld [vmem:[%s226_s7 + $0x28] sm:$0xff] (!%p218_p10)  ;;  %v253_v18 = vld [vmem:[%s226_s7 + $0x18] sm:$0xff] (!%p218_p10)  ;;  %256 = vperm.xlu0 (!%p218_p10), %654, %v249_v9  }
  0x22   : > { %v605_v19 = vpack.c.bf16 (!%p218_p10), %v557_v16, %v556_v13  ;;  %v558_v20 = vld [vmem:[%s226_s7 + $0x30] sm:$0xff] (!%p218_p10)  ;;  %v559_v21 = vld [vmem:[%s226_s7 + $0x38] sm:$0xff] (!%p218_p10)  ;;  %v602_v22 = vpack.c.bf16 (!%p218_p10), %v253_v18, %v252_v17 }
  0x23   : > { %600 = vmatpush3.bf16.msra.mxu0 (!%p218_p10), %v599_v15  ;;  %v608_v23 = vpack.c.bf16 (!%p218_p10), %v559_v21, %v558_v20 }
  0x24   : > { %606 = vmatpush3.bf16.msra.mxu1 (!%p218_p10), %v605_v19  ;;  %601 = vmatprep.subr.bf16.mxu0 (!%p218_p10), %v699_v8 }
  0x25   : > { %607 = vmatprep.subr.bf16.mxu1 %v699_v8  ;;  %s563_s18 = sshll.u32 (%p758_p6), %s689_s14, 3 }
  0x26   : > { %s440_s20 = scalar_lea.vmem (%p758_p6), %s808_s3, %s563_s18 }
  0x27   : > { %603 = vmatpush3.bf16.msra.mxu0 %v602_v22 }
  0x28   : > { %609 = vmatpush3.bf16.msra.mxu1 %v608_v23 }
  0x2a   : > { %585 = vmatmul.mubr.msk.f32.vlgmr.msra.gmra.mrb[0].mxu0 %vm259_vm1, %v248_v24 }
  0x2b   : > { %596 = vmatmul.mubr.msk.f32.vlgmr.msra.gmra.mrb[0].mxu1 %vm259_vm1, %v248_v24 }
  0xa0   : > { %v257_v25 = vpop.permute.xlu0 %256 }
  0xfd   : > { %v329_v26 = vpop.f32.mrb[0].mxu0 }
  0xfe   : > { %v330_v27 = vadd.f32 %v329_v26, %v257_v25  ;;  %v414_v28 = vpop.f32.mrb[0].mxu1  ;;  %v586_v29 = vpop.f32.mrb[1].mxu0 }
  0xff   : > { %v415_v30 = vadd.f32 %v414_v28, %v257_v25  ;;  %v597_v31 = vpop.f32.mrb[1].mxu1 }
 0x100   : > { %v333_v32 = vmul.f32 %v330_v27, %v330_v27  ;;  %v339_v44 = vmul.f32 0.5, %v330_v27 }
 0x101   : > { %v418_v33 = vmul.f32 %v415_v30, %v415_v30  ;;  %v424_v46 = vmul.f32 0.5, %v415_v30 }
 0x102   : > { %v334_v34 = vmul.f32 0.044715, %v333_v32 }
 0x103   : > { %v419_v35 = vmul.f32 0.044715, %v418_v33 }
 0x104   : > { %v335_v36 = vadd.f32 1.0, %v334_v34 }
 0x105   : > { %v420_v37 = vadd.f32 1.0, %v419_v35 }
 0x106   : > { %v336_v38 = vmul.f32 %v335_v36, %v330_v27 }
 0x107   : > { %v421_v39 = vmul.f32 %v420_v37, %v415_v30 }
 0x108   : > { %v337_v40 = vmul.f32 0.7978846, %v336_v38 }
 0x109   : > { %v422_v41 = vmul.f32 0.7978846, %v421_v39 }
 0x10a   : > { %655 = vtanh.f32 %v337_v40 }
 0x10b   : > { %657 = vtanh.f32 %v422_v41 }
 0x114   : > { %v656_v42 = vpop.eup %655  ;;  %435 = sbr.rel (!%p758_p6) target bundleno = 291 (0x123), region = 74 }
 0x115   : > { %v658_v43 = vpop.eup %657  ;;  %v340_v45 = vadd.f32 1.0, %v656_v42 }
 0x116   : > { %v425_v47 = vadd.f32 1.0, %v658_v43 }
 0x117   : > { %v341_v48 = vmul.f32 %v340_v45, %v339_v44 }
 0x118   : > { %v426_v49 = vmul.f32 %v425_v47, %v424_v46 }
 0x119   : > { %342 = vst [vmem:[%s245_s11] sm:$0xff] %v341_v48 }
 0x11a   : > { %561 = vst [vmem:[%s245_s11 + $0x8] sm:$0xff] %v426_v49 }
 0x120   : > { %v470_v50 = vld [vmem:[%s245_s11] sm:$0xff] }
 0x121   : > { %v472_v51 = vld [vmem:[%s245_s11 + $0x8] sm:$0xff]  ;;  %471 = vst [vmem:[%s440_s20] sm:$0xff] %v470_v50 }
 0x122   : > { %473 = vst [vmem:[%s440_s20 + $0x10] sm:$0xff] %v472_v51 }
 0x123 PF: > { %s13_s16 = sadd.s32 1, %s697_s16   ;;  %s810_s12 = smov %s685_s13 }
 0x124   : > { %p10_p11 = scmp.ge.s32.totalorder %s13_s16, 4   ;;  %s811_s13 = smov %s763_s22 }
 0x125   : > { %s812_s14 = smov %s693_s15  ;;  %s813_s15 = smov %s815_s17 }
 0x126   :  { %12 = sbr.rel (!%p10_p11) target bundleno = 3 (0x3), region = 145 }

</bundles_post_ra>
